<compile_context>
chip_gen: v7x
topology: tpu7x:2x2x1
jax: 0.10.0
libtpu: 0.0.40
codegen_flags: <defaults>
</compile_context>

<pallas_src>
import functools
import math

import jax
import jax.numpy as jnp
from jax.experimental import pallas as pl
from jax.experimental.pallas import tpu as pltpu

BN_EPS = 1e-5


def _quantize(a, inte_w=5, deci_w=10):
    # Matches torch quantize(): *2^deci, truncate to int, clamp to +-2^(deci+inte), /2^deci
    shift = 2.0 ** deci_w
    upper = 2.0 ** (deci_w + inte_w)
    q = jnp.trunc(a * shift)
    q = jnp.clip(q, -upper, upper)
    return q / shift


def _round_up(x, m):
    return (x + m - 1) // m * m


def _const_spec(shape):
    """Whole-array, constant-index-map block; single-buffered (resident weights)."""
    idx = lambda j: (0,) * len(shape)
    try:
        return pl.BlockSpec(shape, idx, pipeline_mode=pl.Buffered(1))
    except TypeError:  # older jax without pipeline_mode kwarg
        return pl.BlockSpec(shape, idx)


def _vmem_capacity_bytes():
    try:
        return int(pltpu.get_tpu_info().vmem_capacity_bytes)
    except Exception:
        return 64 * 1024 * 1024  # conservative (v7x per-TensorCore VMEM)


# ---------------------------------------------------------------------------
# Pass 1: fused MXU matmul -> per-tile BN partial statistics only (no act I/O)
# ---------------------------------------------------------------------------
def _gcn_stats_kernel(x_ref, g_ref, stat_ref, *, nt_valid, tb, needs_mask):
    # z columns = (w, o) for the main path [+ down path when concatenated].
    z = jnp.dot(x_ref[...], g_ref[...], preferred_element_type=jnp.float32)
    if needs_mask:
        j = pl.program_id(0)
        row = jax.lax.broadcasted_iota(jnp.int32, (tb, 1), 0) + j * tb
        valid = (row < nt_valid).astype(jnp.float32)
        nvalid = jnp.minimum(tb, nt_valid - j * tb).astype(jnp.float32)
        z = z * valid
        zsum = jnp.sum(z, axis=0, keepdims=True)
        zc = (z - zsum / nvalid) * valid
    else:
        zsum = jnp.sum(z, axis=0, keepdims=True)
        zc = z - zsum * (1.0 / tb)
    zm2 = jnp.sum(zc * zc, axis=0, keepdims=True)          # centered (stable merge)
    stat_ref[...] = jnp.concatenate([zsum, zm2], axis=0)[None]


# ---------------------------------------------------------------------------
# Pass 2: recompute matmul, BN affine + residual add + ReLU, lane-dense store
# ---------------------------------------------------------------------------
def _gcn_apply_kernel(x_ref, g_ref, sc_ref, sh_ref, o_ref, *, vo, has_down):
    x = x_ref[...]
    z = jnp.dot(x, g_ref[...], preferred_element_type=jnp.float32)
    z = z * sc_ref[...]
    if has_down:
        y = z[:, :vo] + z[:, vo:]          # BN(main) + BN(down), 128-aligned slice
    else:
        y = z + x.astype(jnp.float32)      # identity residual: same (v,c) lane layout
    o_ref[...] = jnp.maximum(y + sh_ref[...], 0.0)


def _merge_batch_stats(stats, counts, v, n_ch, total):
    """Chan parallel merge of per-(tile, vertex) partials -> per-channel mean/var."""
    sums = stats[:, 0, :].reshape(-1, v, n_ch)
    m2s = stats[:, 1, :].reshape(-1, v, n_ch)
    cnt = counts.reshape(-1, 1, 1)
    mean = jnp.sum(sums, axis=(0, 1)) / total
    gmean = sums / cnt
    m2 = jnp.sum(m2s, axis=(0, 1)) + jnp.sum(cnt * (gmean - mean[None, None, :]) ** 2,
                                             axis=(0, 1))
    return mean, m2 / total                                   # biased var (training BN)


def unit_gcn_forward(x_nctv, params, batch_tile=None, use_bf16=False):
    """x_nctv: (N, C, T, V) float32 — PyTorch NCTV convention."""
    N, C, T, V = x_nctv.shape
    S, O = params['Wd'].shape[0], params['Wd'].shape[1]
    NT = N * T
    M = NT * V                                                # rows per BN channel
    has_down = (C != O)
    VO = V * O
    K_out = 2 * VO if has_down else VO

    in_dtype = jnp.bfloat16 if use_bf16 else jnp.float32      # bf16 is opt-in
    esz = 2 if use_bf16 else 4

    # ---- generation-aware VMEM budget & batch-tile selection ----
    vmem_cap = _vmem_capacity_bytes()                         # 128 MiB v5e/v6e, 64 MiB v7x
    vmem_limit = int(min(vmem_cap * 3 // 4, 96 * 1024 * 1024))
    budget = int(vmem_limit * 0.8)

    weight_bytes = esz * V * C * K_out
    if weight_bytes > budget:
        raise ValueError(
            f"fused graph operator ({weight_bytes >> 20} MiB) exceeds the VMEM budget "
            f"({budget >> 20} MiB); use the factored / column-tiled path for these shapes")

    if batch_tile is not None:
        TB = max(8, _round_up(int(batch_tile), 8))
    else:
        # x tile (double-buffered) + out tile (double-buffered) + z intermediates
        per_row = esz * 2 * V * C + 4 * (2 * VO + 2 * K_out)
        TB = (budget - weight_bytes) // per_row
        TB = int(max(8, min(TB, 1024))) // 8 * 8
    TB = min(TB, _round_up(NT, 8))

    NT_pad = _round_up(NT, TB)
    pad = NT_pad - NT
    n_tiles = NT_pad // TB

    # ---- wrapper-side layout & operator preprocessing (plain JAX) ----
    # TODO(synk): the NCTV<->channels-last transposes are separate XLA passes; keep the
    #             surrounding network channels-last to remove this boundary traffic.
    x2d = jnp.transpose(x_nctv, (0, 2, 3, 1)).reshape(NT, V * C)
    if pad:
        x2d = jnp.pad(x2d, ((0, pad), (0, 0)))

    A_q = _quantize(params['A'] + params['PA'])                          # (S, V, V)
    # main operator: G[(v,c),(w,o)] = sum_i A_q[i,v,w] * Wd[i,o,c]
    G = jnp.einsum('ivw,ioc->vcwo', A_q, params['Wd']).reshape(V * C, VO)
    if has_down:
        # down path folded in as extra columns: kron(I_V, Wdown^T)
        D = jnp.einsum('vw,oc->vcwo', jnp.eye(V, dtype=jnp.float32),
                       params['Wdown']).reshape(V * C, VO)
        G = jnp.concatenate([G, D], axis=1)                              # (V*C, 2*V*O)
    # NOTE: conv biases (bd, bdown) dropped — training-mode BN removes per-channel
    # constants exactly via mean subtraction.

    x2d = x2d.astype(in_dtype)
    G = G.astype(in_dtype)

    cparams = pltpu.CompilerParams(
        dimension_semantics=("parallel",),
        vmem_limit_bytes=vmem_limit)

    # ---- pass 1: fused matmul -> per-tile BN partial statistics ----
    stats = pl.pallas_call(
        functools.partial(_gcn_stats_kernel, nt_valid=NT, tb=TB, needs_mask=pad > 0),
        out_shape=jax.ShapeDtypeStruct((n_tiles, 2, K_out), jnp.float32),
        grid_spec=pltpu.PrefetchScalarGridSpec(
            num_scalar_prefetch=0,
            grid=(n_tiles,),
            in_specs=[
                pl.BlockSpec((TB, V * C), lambda j: (j, 0)),
                _const_spec((V * C, K_out)),
            ],
            out_specs=pl.BlockSpec((1, 2, K_out), lambda j: (j, 0, 0)),
        ),
        compiler_params=cparams,
    )(x2d, G)

    # ---- fold partials into per-channel BN affine (tiny O-sized math) ----
    counts = jnp.clip(NT - jnp.arange(n_tiles) * TB, 1, TB).astype(jnp.float32)
    ymean, yvar = _merge_batch_stats(stats[:, :, :VO], counts, V, O, jnp.float32(M))
    y_scale = params['bn_gamma'] * jax.lax.rsqrt(yvar + BN_EPS)
    y_shift = params['bn_beta'] - ymean * y_scale

    if has_down:
        dmean, dvar = _merge_batch_stats(stats[:, :, VO:], counts, V, O, jnp.float32(M))
        d_scale = params['dbn_gamma'] * jax.lax.rsqrt(dvar + BN_EPS)
        d_shift = params['dbn_beta'] - dmean * d_scale
        sc = jnp.concatenate([jnp.tile(y_scale, V), jnp.tile(d_scale, V)]).reshape(1, K_out)
        sh = jnp.tile(y_shift + d_shift, V).reshape(1, VO)
    else:
        sc = jnp.tile(y_scale, V).reshape(1, VO)
        sh = jnp.tile(y_shift, V).reshape(1, VO)

    # ---- pass 2: recompute matmul, BN affine + residual + ReLU ----
    out2d = pl.pallas_call(
        functools.partial(_gcn_apply_kernel, vo=VO, has_down=has_down),
        out_shape=jax.ShapeDtypeStruct((NT_pad, VO), jnp.float32),
        grid_spec=pltpu.PrefetchScalarGridSpec(
            num_scalar_prefetch=0,
            grid=(n_tiles,),
            in_specs=[
                pl.BlockSpec((TB, V * C), lambda j: (j, 0)),
                _const_spec((V * C, K_out)),
                _const_spec((1, K_out)),
                _const_spec((1, VO)),
            ],
            out_specs=pl.BlockSpec((TB, VO), lambda j: (j, 0)),
        ),
        compiler_params=cparams,
    )(x2d, G, sc, sh)

    out = out2d[:NT].reshape(N, T, V, O)
    return jnp.transpose(out, (0, 3, 1, 2))                   # back to NCTV


def unit_gcn_reference(x, params):
    """Pure-JAX reference mirroring the PyTorch forward (NCTV)."""
    N, C, T, V = x.shape
    S, O = params['Wd'].shape[0], params['Wd'].shape[1]
    A_q = _quantize(params['A'] + params['PA'])
    x_mat = x.reshape(N, C * T, V)
    y = jnp.zeros((N, O, T, V), jnp.float32)
    for i in range(S):
        z = jnp.matmul(x_mat, A_q[i]).reshape(N, C, T, V)
        y = y + (jnp.einsum('oc,nctv->notv', params['Wd'][i], z)
                 + params['bd'][i][None, :, None, None])
    mean = y.mean(axis=(0, 2, 3), keepdims=True)
    var = ((y - mean) ** 2).mean(axis=(0, 2, 3), keepdims=True)
    y = ((y - mean) / jnp.sqrt(var + BN_EPS)
         * params['bn_gamma'][None, :, None, None]
         + params['bn_beta'][None, :, None, None])
    if C != O:
        d = (jnp.einsum('oc,nctv->notv', params['Wdown'], x)
             + params['bdown'][None, :, None, None])
        dm = d.mean(axis=(0, 2, 3), keepdims=True)
        dv = ((d - dm) ** 2).mean(axis=(0, 2, 3), keepdims=True)
        down = ((d - dm) / jnp.sqrt(dv + BN_EPS)
                * params['dbn_gamma'][None, :, None, None]
                + params['dbn_beta'][None, :, None, None])
    else:
        down = x
    return jnp.maximum(y + down, 0.0)


if __name__ == "__main__":
    key = jax.random.PRNGKey(0)

    def make_params(k, S, V, Cin, Cout):
        k_a, k_wd, k_down = jax.random.split(k, 3)
        return {
            'A': jax.random.uniform(k_a, (S, V, V), jnp.float32),        # synthetic adjacency
            'PA': jnp.full((S, V, V), 1e-6, jnp.float32),                # init.constant(PA, 1e-6)
            'Wd': jax.random.normal(k_wd, (S, Cout, Cin), jnp.float32)
                  * math.sqrt(2.0 / (Cout * Cin * 1 * S)),               # conv_branch_init
            'bd': jnp.zeros((S, Cout), jnp.float32),
            'Wdown': jax.random.normal(k_down, (Cout, Cin), jnp.float32)
                     * math.sqrt(2.0 / Cout),                            # kaiming fan_out
            'bdown': jnp.zeros((Cout,), jnp.float32),
            'bn_gamma': jnp.full((Cout,), 1e-6, jnp.float32),            # bn_init(self.bn, 1e-6)
            'bn_beta': jnp.zeros((Cout,), jnp.float32),
            'dbn_gamma': jnp.ones((Cout,), jnp.float32),                 # bn_init(down bn, 1)
            'dbn_beta': jnp.zeros((Cout,), jnp.float32),
        }

    # Case 1: Cin != Cout (conv+BN down path); NT = 112 not a tile multiple, so this
    # exercises padding + masked BN partials + the multi-tile Chan stat merge.
    k1, k2, key = jax.random.split(key, 3)
    N, Cin, T, V, Cout, S = 2, 4, 56, 16, 8, 3
    p1 = make_params(k1, S, V, Cin, Cout)
    x1 = jax.random.normal(k2, (N, Cin, T, V), jnp.float32)
    out1 = jax.block_until_ready(unit_gcn_forward(x1, p1, batch_tile=64))
    ref1 = unit_gcn_reference(x1, p1)
    assert out1.shape == (N, Cout, T, V)
    err1 = float(jnp.max(jnp.abs(out1 - ref1)))
    assert jnp.allclose(out1, ref1, rtol=1e-3, atol=1e-4), f"down-path max abs diff {err1}"

    # Case 2: Cin == Cout (identity residual), auto batch-tile, single grid step.
    k3, k4, _ = jax.random.split(key, 3)
    N2, C2, T2, V2 = 2, 8, 24, 16
    p2 = make_params(k3, S, V2, C2, C2)
    x2 = jax.random.normal(k4, (N2, C2, T2, V2), jnp.float32)
    out2 = jax.block_until_ready(unit_gcn_forward(x2, p2))
    ref2 = unit_gcn_reference(x2, p2)
    assert out2.shape == (N2, C2, T2, V2)
    err2 = float(jnp.max(jnp.abs(out2 - ref2)))
    assert jnp.allclose(out2, ref2, rtol=1e-3, atol=1e-4), f"identity-path max abs diff {err2}"

    print("KERNEL_OK")
</pallas_src>

<mosaic_0001>
module attributes {stable_mosaic.version = 11 : i64} {
  func.func @_gcn_stats_kernel(%arg0: i32, %arg1: memref<64x64xf32, #tpu.memory_space<vmem>>, %arg2: memref<64x256xf32, #tpu.memory_space<vmem>>, %arg3: memref<1x2x256xf32, #tpu.memory_space<vmem>>) attributes {dimension_semantics = [#tpu.dimension_semantics<parallel>], iteration_bounds = array<i64: 2>, scalar_prefetch = 0 : i64, scratch_operands = 0 : i64, tpu.core_type = #tpu.core_type<tc>, window_params = [{transform_indices = @transform_0, window_bounds = array<i64: 64, 64>}, {pipeline_mode = #tpu.pipeline_mode<synchronous>, transform_indices = @transform_1, window_bounds = array<i64: 64, 256>}, {transform_indices = @transform_2, window_bounds = array<i64: 1, 2, 256>}]} {
    %c0 = arith.constant 0 : index
    %c0_0 = arith.constant 0 : index
    %0 = vector.load %arg1[%c0, %c0_0] : memref<64x64xf32, #tpu.memory_space<vmem>>, vector<64x64xf32>
    %c0_1 = arith.constant 0 : index
    %c0_2 = arith.constant 0 : index
    %1 = vector.load %arg2[%c0_1, %c0_2] : memref<64x256xf32, #tpu.memory_space<vmem>>, vector<64x256xf32>
    %cst = arith.constant dense<0.000000e+00> : vector<64x256xf32>
    %2 = tpu.matmul %0, %1, %cst {dimension_numbers = #tpu.dot_dimension_numbers<[1], [0], [0], [1], [0, 0, 1, 1], [], []>} : vector<64x64xf32>, vector<64x256xf32>, vector<64x256xf32> -> vector<64x256xf32>
    %3 = tpu.iota {dimensions = array<i32: 0>} : vector<64x1xi32>
    %c64_i32 = arith.constant 64 : i32
    %4 = arith.muli %arg0, %c64_i32 : i32
    %5 = vector.broadcast %4 : i32 to vector<64x1xi32>
    %6 = arith.addi %3, %5 : vector<64x1xi32>
    %c112_i32 = arith.constant 112 : i32
    %7 = vector.broadcast %c112_i32 : i32 to vector<64x1xi32>
    %8 = arith.cmpi slt, %6, %7 : vector<64x1xi32>
    %9 = arith.extui %8 : vector<64x1xi1> to vector<64x1xi32>
    %10 = arith.sitofp %9 : vector<64x1xi32> to vector<64x1xf32>
    %c64_i32_3 = arith.constant 64 : i32
    %11 = arith.muli %arg0, %c64_i32_3 : i32
    %c112_i32_4 = arith.constant 112 : i32
    %12 = arith.subi %c112_i32_4, %11 : i32
    %c64_i32_5 = arith.constant 64 : i32
    %13 = arith.minsi %c64_i32_5, %12 : i32
    %14 = arith.sitofp %13 : i32 to f32
    %15 = vector.broadcast %10 : vector<64x1xf32> to vector<64x256xf32>
    %16 = arith.mulf %2, %15 : vector<64x256xf32>
    %cst_6 = arith.constant dense<0.000000e+00> : vector<256xf32>
    %17 = vector.multi_reduction <add>, %16, %cst_6 [0] : vector<64x256xf32> to vector<256xf32>
    %18 = vector.shape_cast %17 : vector<256xf32> to vector<1x256xf32>
    %19 = vector.broadcast %14 : f32 to vector<1x256xf32>
    %20 = arith.divf %18, %19 : vector<1x256xf32>
    %21 = vector.broadcast %20 : vector<1x256xf32> to vector<64x256xf32>
    %22 = arith.subf %16, %21 : vector<64x256xf32>
    %23 = vector.broadcast %10 : vector<64x1xf32> to vector<64x256xf32>
    %24 = arith.mulf %22, %23 : vector<64x256xf32>
    %25 = arith.mulf %24, %24 : vector<64x256xf32>
    %cst_7 = arith.constant dense<0.000000e+00> : vector<256xf32>
    %26 = vector.multi_reduction <add>, %25, %cst_7 [0] : vector<64x256xf32> to vector<256xf32>
    %27 = vector.shape_cast %26 : vector<256xf32> to vector<1x256xf32>
    %28 = tpu.concatenate %18, %27 in 0 : vector<1x256xf32>, vector<1x256xf32> -> vector<2x256xf32>
    %29 = vector.shape_cast %28 : vector<2x256xf32> to vector<1x2x256xf32>
    %c0_8 = arith.constant 0 : index
    %c0_9 = arith.constant 0 : index
    %c0_10 = arith.constant 0 : index
    %30 = vector.load %arg3[%c0_8, %c0_9, %c0_10] : memref<1x2x256xf32, #tpu.memory_space<vmem>>, vector<1x2x256xf32>
    tpu.vector_store %arg3[%c0_8, %c0_9, %c0_10], %29 {strides = array<i32>} : memref<1x2x256xf32, #tpu.memory_space<vmem>>, vector<1x2x256xf32>,
    return
  }
  func.func @transform_0(%arg0: i32) -> (i32, i32) {
    %c0_i32 = arith.constant 0 : i32
    %c0_i32_0 = arith.constant 0 : i32
    return %arg0, %c0_i32 : i32, i32
  }
  func.func @transform_1(%arg0: i32) -> (i32, i32) {
    %c0_i32 = arith.constant 0 : i32
    %c0_i32_0 = arith.constant 0 : i32
    %c0_i32_1 = arith.constant 0 : i32
    return %c0_i32, %c0_i32_0 : i32, i32
  }
  func.func @transform_2(%arg0: i32) -> (i32, i32, i32) {
    %c0_i32 = arith.constant 0 : i32
    %c0_i32_0 = arith.constant 0 : i32
    %c0_i32_1 = arith.constant 0 : i32
    return %arg0, %c0_i32, %c0_i32_0 : i32, i32, i32
  }
}

</mosaic_0001>

<bundles_post_ra>
// kernel: tpu_custom_call.1
= control target key start
LH: loop header
LB: loop body
LE: loop exit
PB: predicated region body
PF: predicated region fallthrough
CT: control target
= control target key end

     0   :  { %7 = vsyncpa [#allocation3], 0  ;;  %s1026_s0 = inlined_call_operand.vmem [shape: f32[128,64], index: 0, kind: input, shape index: {}]   ;;  %s1027_s1 = inlined_call_operand.vmem [shape: f32[64,256], index: 1, kind: input, shape index: {}]   ;;  %s1028_s2 = inlined_call_operand.hbm [shape: f32[2,2,256], index: 2, kind: output, shape index: {}]  }
   0x1   :  { %9 = vsyncpa [#allocation3 + $0x1], 0  ;;  %s740_s9 = smov 0   ;;  %s742_s10 = smov 0  }
   0x2   :  { %s744_s11 = smov 0   ;;  %s746_s12 = smov 0  }
   0x3 LB: > { %s761_s13 = sadd.s32 4294967295, %s721_s12   ;;  %s562_s14 = sadd.s32 4294967294, %s721_s12   ;;  %s721_s12 = sphi %s746_s12, %s1035_s12   ;;  %s717_s11 = sphi %s744_s11, %s1034_s11   ;;  %s713_s10 = sphi %s742_s10, %s1033_s10   ;;  %s709_s9 = sphi %s740_s9, %s1032_s9  }
   0x4   : > { %s765_s15 = sadd.s32 1, %s721_s12   ;;  %s69_s16 = sadd.s32 1, %s717_s11 }
   0x5   : > { %s66_s17 = ssub.s32 %s721_s12, %s765_s15  ;;  %p79_p0 = scmp.ne.s32.totalorder %s717_s11, %s713_s10 }
   0x6   : > { %p67_p1 = scmp.eq.s32.totalorder %s66_s17, 0  ;;  %p80_p2 = scmp.eq.s32.totalorder %s761_s13, 1 }
   0x7   : > { %p85_p3 = scmp.ne.s32.totalorder %s713_s10, %s709_s9  ;;  %p86_p4 = scmp.eq.s32.totalorder %s562_s14, 1 }
   0x8   : > { %s776_s18 = scalar_select %p67_p1, %s717_s11, %s69_s16  }
   0x9   : > { %p778_p5 = por %p80_p2, %p79_p0  ;;  %p782_p6 = por %p86_p4, %p85_p3 }
   0xa   : > { %p565_p7 = scmp.ge.s32.totalorder %s721_s12, 1  ;;  %p116_p8 = scmp.lt.s32.totalorder %s721_s12, 3 }
   0xc   : > { %p117_p9 = pnand %p565_p7, %p116_p8 }
   0xd   : > { %v153_v0 = vld [vmem:[%s1027_s1 + $0x8] sm:$0xff] (!%p117_p9)  ;;  %v155_v1 = vld [vmem:[%s1027_s1 + $0x18] sm:$0xff] (!%p117_p9)  ;;  %v152_v2 = vld [vmem:[%s1027_s1] sm:$0xff] (!%p117_p9)  ;;  %s567_s27 = sshll.u32 (!%p117_p9), %s761_s13, 3  ;;  %v723_v7 = vmov (!%p117_p9), 0.0   ;;  %vm168_vm0 = vcmask (!%p117_p9), 523264   ;;  %v306_v33 = vlaneseq (!%p117_p9) }
   0xe   : > { %120 = sbr.rel (%p117_p9) target bundleno = 336 (0x150), region = 28  ;;  %v593_v3 = vpack.c.bf16 (!%p117_p9), %v155_v1, %v153_v0  ;;  %v154_v4 = vld [vmem:[%s1027_s1 + $0x10] sm:$0xff] (!%p117_p9)  ;;  %v157_v5 = vld [vmem:[%s1027_s1 + $0x28] sm:$0xff] (!%p117_p9)  ;;  %v159_v6 = vld [vmem:[%s1027_s1 + $0x38] sm:$0xff] (!%p117_p9)  ;;  %257 = vmatprep.mubr.f32.mxu0 (!%p117_p9), %v723_v7  ;;  %281 = vmatprep.mubr.f32.mxu1 (!%p117_p9), %v723_v7  ;;  %p818_p10 = scmp.lt.s32.totalorder (!%p117_p9), %s567_s27, 15  ;;  %vm473_vm9 = vcmask (!%p117_p9), 1040384  }
   0xf   : > { %v595_v8 = vpack.c.bf16 (!%p117_p9), %v154_v4, %v152_v2  ;;  %v597_v9 = vpack.c.bf16 (!%p117_p9), %v159_v6, %v157_v5  ;;  %v156_v10 = vld [vmem:[%s1027_s1 + $0x20] sm:$0xff] (!%p117_p9)  ;;  %v158_v11 = vld [vmem:[%s1027_s1 + $0x30] sm:$0xff] (!%p117_p9)  ;;  %v161_v12 = vld [vmem:[%s1027_s1 + $0x48] sm:$0xff] (!%p117_p9)  ;;  %v307_v34 = vshrl.u32 (!%p117_p9), %v306_v33, 7  ;;  %s135_s23 = sand.u32 (!%p117_p9), 1, %s713_s10   ;;  %s724_s5 = smov (!%p117_p9), [#allocation2]  }
  0x10   : > { %594 = vmatprep.subr.bf16.mxu0 (!%p117_p9), %v593_v3  ;;  %609 = vmatprep.subr.bf16.mxu1 (!%p117_p9), %v593_v3  ;;  %v163_v13 = vld [vmem:[%s1027_s1 + $0x58] sm:$0xff] (!%p117_p9)  ;;  %v599_v14 = vpack.c.bf16 (!%p117_p9), %v158_v11, %v156_v10  ;;  %v160_v16 = vld [vmem:[%s1027_s1 + $0x40] sm:$0xff] (!%p117_p9)  ;;  %v162_v17 = vld [vmem:[%s1027_s1 + $0x50] sm:$0xff] (!%p117_p9)  ;;  %s566_s24 = sshll.u32 (!%p117_p9), %s135_s23, 2  ;;  %s489_s3 = scalar_lea.sflag (!%p117_p9), [#allocation3], %s135_s23 }
  0x11   : > { %596 = vmatpush1.bf16.msra.mxu0 (!%p117_p9), %v595_v8  ;;  %613 = vmatpush1.bf16.msra.mxu1 (!%p117_p9), %v595_v8  ;;  %v601_v15 = vpack.c.bf16 (!%p117_p9), %v163_v13, %v161_v12  ;;  %v165_v18 = vld [vmem:[%s1027_s1 + $0x68] sm:$0xff] (!%p117_p9)  ;;  %v167_v19 = vld [vmem:[%s1027_s1 + $0x78] sm:$0xff] (!%p117_p9)  ;;  %v603_v20 = vpack.c.bf16 (!%p117_p9), %v162_v17, %v160_v16  ;;  %v164_v22 = vld [vmem:[%s1027_s1 + $0x60] sm:$0xff] (!%p117_p9)  ;;  %v308_v35 = vadd.s32 (!%p117_p9), 8, %v307_v34  ;;  %v309_v39 = vadd.s32 (!%p117_p9), 16, %v307_v34  ;;  %s137_s25 = scalar_lea.vmem (!%p117_p9), [#allocation2], %s566_s24 }
  0x12   : > { %598 = vmatprep.subr.bf16.mxu0 (!%p117_p9), %v597_v9  ;;  %610 = vmatprep.subr.bf16.mxu1 (!%p117_p9), %v597_v9  ;;  %v605_v21 = vpack.c.bf16 (!%p117_p9), %v167_v19, %v165_v18  ;;  %v166_v23 = vld [vmem:[%s1027_s1 + $0x70] sm:$0xff] (!%p117_p9)  ;;  %v310_v41 = vadd.s32 (!%p117_p9), 24, %v307_v34  ;;  %v311_v44 = vadd.s32 (!%p117_p9), 32, %v307_v34  ;;  %v312_v49 = vadd.s32 (!%p117_p9), 40, %v307_v34  ;;  %s503_s26 = sshll.u32 (!%p117_p9), %s137_s25, 4  ;;  %s663_s6 = sshll.u32 (!%p117_p9), %s724_s5, 4  ;;  %s986_s26 = int_to_ptr.vmem [resolvable:$true] %s503_s26  ;;  %s664_s6 = int_to_ptr.vmem [resolvable:$false] %s663_s6 }
  0x13   : > { %v607_v24 = vpack.c.bf16 (!%p117_p9), %v166_v23, %v164_v22  ;;  %v313_v58 = vadd.s32 (!%p117_p9), 48, %v307_v34  ;;  %v314_v59 = vadd.s32 (!%p117_p9), 56, %v307_v34  ;;  %s659_s4 = scalar_lea.vmem (!%p117_p9), %s986_s26, 64  ;;  %s665_s7 = scalar_lea.vmem (!%p117_p9), %s664_s6, 128 }
  0x14   : > { %p660_p12 = scmp.ne.s32.totalorder (!%p117_p9), %s986_s26, %s659_s4  ;;  %p666_p1 = scmp.lt.s32.totalorder (!%p117_p9), %s986_s26, %s664_s6 }
  0x15   : > { %s1037_s27 = smov (!%p818_p10, %s567_s27), 15  ;;  %600 = vmatpush1.bf16.msra.mxu0 %v599_v14  ;;  %614 = vmatpush1.bf16.msra.mxu1 %v599_v14  ;;  %p667_p2 = scmp.lt.s32.totalorder %s665_s7, %s659_s4 }
  0x16   : > { %602 = vmatprep.subr.bf16.mxu0 %v601_v15  ;;  %611 = vmatprep.subr.bf16.mxu1 %v601_v15  ;;  %s568_s14 = sshll.u32 %s1037_s27, 3  ;;  %s863_s27 = sshll.u32 %s761_s13, 6 }
  0x17   : > { %s142_s21 = scalar_lea.vmem %s1026_s0, %s568_s14  ;;  %v316_v36 = vstv %s863_s27  ;;  %s349_s13 = ssub.s32 112, %s863_s27 }
  0x18   : > { %v144_v25 = vld [vmem:[%s142_s21] sm:$0xff]  ;;  %v145_v27 = vld [vmem:[%s142_s21 + $0x8] sm:$0xff]  ;;  %v146_v29 = vld [vmem:[%s142_s21 + $0x10] sm:$0xff]  ;;  %v317_v37 = vadd.s32 %v316_v36, %v307_v34  ;;  %v318_v38 = vadd.s32 %v316_v36, %v308_v35  ;;  %v319_v40 = vadd.s32 %v316_v36, %v309_v39  ;;  %v320_v50 = vadd.s32 %v316_v36, %v310_v41  ;;  %p350_p11 = scmp.lt.s32.totalorder %s349_s13, 64  ;;  %s984_s30 = scalar_lea.hbm %s1028_s2, %s863_s27 }
  0x19   : > { %604 = vmatpush1.bf16.msra.mxu0 %v603_v20  ;;  %615 = vmatpush1.bf16.msra.mxu1 %v603_v20  ;;  %v148_v26 = vld [vmem:[%s142_s21 + $0x20] sm:$0xff]  ;;  %v149_v28 = vld [vmem:[%s142_s21 + $0x28] sm:$0xff]  ;;  %v150_v30 = vld [vmem:[%s142_s21 + $0x30] sm:$0xff]  ;;  %v321_v52 = vadd.s32 %v316_v36, %v311_v44  ;;  %v322_v0 = vadd.s32 %v316_v36, %v312_v49  ;;  %v323_v6 = vadd.s32 %v316_v36, %v313_v58  ;;  %p661_p13 = pnand %p660_p12, %p778_p5  ;;  %p668_p3 = por %p667_p2, %p666_p1 }
  0x1a   : > { %606 = vmatprep.subr.bf16.mxu0 %v605_v21  ;;  %612 = vmatprep.subr.bf16.mxu1 %v605_v21  ;;  %v147_v31 = vld [vmem:[%s142_s21 + $0x18] sm:$0xff]  ;;  %vm325_vm1 = vcmp.lt.s32.totalorder %v317_v37, 112  ;;  %vm326_vm2 = vcmp.lt.s32.totalorder %v318_v38, 112  ;;  %vm327_vm3 = vcmp.lt.s32.totalorder %v319_v40, 112  ;;  %vm328_vm4 = vcmp.lt.s32.totalorder %v320_v50, 112  ;;  %s1039_s13 = smov (!%p350_p11, %s349_s13), 64 }
  0x1b   : > { %v151_v32 = vld [vmem:[%s142_s21 + $0x38] sm:$0xff]  ;;  %v867_v47 = vsel %vm325_vm1, 1.0, %v723_v7  ;;  %v870_v48 = vsel %vm326_vm2, 1.0, %v723_v7  ;;  %v885_v62 = vsel %vm327_vm3, 1.0, %v723_v7  ;;  %vm329_vm5 = vcmp.lt.s32.totalorder %v321_v52, 112  ;;  %s352_s22 = scvt.s32.f32 %s1039_s13  ;;  %p662_p0 = pneg %p661_p13 }
  0x1c   : > { %v324_v9 = vadd.s32 %v316_v36, %v314_v59  ;;  %v899_v11 = vsel %vm328_vm4, 1.0, %v723_v7  ;;  %vm330_vm6 = vcmp.lt.s32.totalorder %v322_v0, 112  ;;  %v903_v13 = vsel %vm329_vm5, 1.0, %v723_v7 }
  0x1d   : > { %608 = vmatpush1.bf16.msra.mxu0 %v607_v24  ;;  %616 = vmatpush1.bf16.msra.mxu1 %v607_v24  ;;  %vm331_vm7 = vcmp.lt.s32.totalorder %v323_v6, 112  ;;  %v908_v20 = vsel %vm330_vm6, 1.0, %v723_v7  ;;  %v395_v38 = vstv %s352_s22  ;;  %p669_p4 = pnand %p668_p3, %p662_p0 }
  0x1e   : > { %vm332_vm8 = vcmp.lt.s32.totalorder %v324_v9, 112  ;;  %657 = vrcp.f32 %v395_v38 }
  0x20   : > { %569 = vmatmul.mubr.msk.f32.vlgmr.msra.gmra.mrb[0].mxu0 %vm168_vm0, %v144_v25  ;;  %573 = vmatmul.mubr.msk.f32.vlgmr.msra.gmra.mrb[0].mxu1 %vm168_vm0, %v148_v26  ;;  %v919_v26 = vsel %vm331_vm7, 1.0, %v723_v7 }
  0x21   : > { %263 = vmatprep.mubr.f32.mxu0 %v723_v7  ;;  %287 = vmatprep.mubr.f32.mxu1 %v723_v7 }
  0x24   : > { %570 = vmatmul.mubr.msk.f32.gmra.mrb[2].mxu0 %vm168_vm0, %v145_v27  ;;  %574 = vmatmul.mubr.msk.f32.gmra.mrb[2].mxu1 %vm168_vm0, %v149_v28  ;;  %v922_v27 = vsel %vm332_vm8, 1.0, %v723_v7 }
  0x25   : > { %269 = vmatprep.mubr.f32.mxu0 %v723_v7  ;;  %293 = vmatprep.mubr.f32.mxu1 %v723_v7 }
  0x28   : > { %571 = vmatmul.mubr.msk.f32.gmra.mrb[4].mxu0 %vm168_vm0, %v146_v29  ;;  %575 = vmatmul.mubr.msk.f32.gmra.mrb[4].mxu1 %vm168_vm0, %v150_v30 }
  0x29   : > { %275 = vmatprep.mubr.f32.mxu0 %v723_v7  ;;  %299 = vmatprep.mubr.f32.mxu1 %v723_v7 }
  0x2c   : > { %572 = vmatmul.mubr.msk.f32.gmra.mrb[6].mxu0 %vm168_vm0, %v147_v31  ;;  %576 = vmatmul.mubr.msk.f32.gmra.mrb[6].mxu1 %vm168_vm0, %v151_v32 }
  0xf3   : > { %v259_v42 = vpop.f32.mrb[0].mxu0  ;;  %v283_v43 = vpop.f32.mrb[0].mxu1 }
  0xf4   : > { %v261_v45 = vpop.f32.mrb[1].mxu0  ;;  %v285_v46 = vpop.f32.mrb[1].mxu1  ;;  %v873_v54 = vmul.f32 %v867_v47, %v259_v42  ;;  %v361_v22 = vmul.f32 %v903_v13, %v283_v43 }
  0xf5   : > { %v879_v60 = vmul.f32 %v867_v47, %v261_v45  ;;  %v915_v24 = vmul.f32 %v903_v13, %v285_v46 }
  0xf7   : > { %v265_v51 = vpop.f32.mrb[2].mxu0  ;;  %v289_v53 = vpop.f32.mrb[2].mxu1 }
  0xf8   : > { %v876_v55 = vmul.f32 %v870_v48, %v265_v51  ;;  %v267_v56 = vpop.f32.mrb[3].mxu0  ;;  %v291_v57 = vpop.f32.mrb[3].mxu1  ;;  %v363_v28 = vmul.f32 %v908_v20, %v289_v53 }
  0xf9   : > { %v882_v61 = vmul.f32 %v870_v48, %v267_v56  ;;  %v926_v30 = vmul.f32 %v908_v20, %v291_v57  ;;  %v658_v53 = vpop.eup %657 }
  0xfa   : > { %v369_v63 = vadd.f32 %v876_v55, %v873_v54 }
  0xfb   : > { %v382_v1 = vadd.f32 %v882_v61, %v879_v60  ;;  %v271_v2 = vpop.f32.mrb[4].mxu0  ;;  %v295_v3 = vpop.f32.mrb[4].mxu1 }
  0xfc   : > { %v893_v4 = vmul.f32 %v885_v62, %v271_v2  ;;  %v273_v5 = vpop.f32.mrb[5].mxu0  ;;  %v297_v8 = vpop.f32.mrb[5].mxu1  ;;  %v365_v32 = vmul.f32 %v919_v26, %v295_v3 }
  0xfd   : > { %v896_v10 = vmul.f32 %v885_v62, %v273_v5  ;;  %v934_v35 = vmul.f32 %v919_v26, %v297_v8 }
  0xfe   : > { %v370_v12 = vadd.f32 %v369_v63, %v893_v4 }
  0xff   : > { %v383_v14 = vadd.f32 %v382_v1, %v896_v10  ;;  %v277_v15 = vpop.f32.mrb[6].mxu0  ;;  %v301_v16 = vpop.f32.mrb[6].mxu1 }
 0x100   : > { %v359_v17 = vmul.f32 %v899_v11, %v277_v15  ;;  %v279_v18 = vpop.f32.mrb[7].mxu0  ;;  %v303_v19 = vpop.f32.mrb[7].mxu1  ;;  %v931_v34 = vmul.f32 %v922_v27, %v301_v16 }
 0x101   : > { %v911_v21 = vmul.f32 %v899_v11, %v279_v18  ;;  %v938_v36 = vmul.f32 %v922_v27, %v303_v19 }
 0x102   : > { %v371_v23 = vadd.f32 %v370_v12, %v359_v17 }
 0x103   : > { %v384_v25 = vadd.f32 %v383_v14, %v911_v21 }
 0x104   : > { %v372_v29 = vadd.f32 %v371_v23, %v361_v22 }
 0x105   : > { %v385_v31 = vadd.f32 %v384_v25, %v915_v24 }
 0x106   : > { %v373_v33 = vadd.f32 %v372_v29, %v363_v28 }
 0x107   : > { %v386_v7 = vadd.f32 %v385_v31, %v926_v30 }
 0x108   : > { %v374_v37 = vadd.f32 %v373_v33, %v365_v32 }
 0x109   : > { %v387_v39 = vadd.f32 %v386_v7, %v934_v35 }
 0x10a   : > { %v375_v40 = vadd.f32 %v374_v37, %v931_v34 }
 0x10b   : > { %v388_v41 = vadd.f32 %v387_v39, %v938_v36 }
 0x10c   : > { %v376_v42 = vrot.slane %v375_v40, 4 }
 0x10d   : > { %v389_v43 = vrot.slane %v388_v41, 4 }
 0x10e   : > { %v377_v44 = vadd.f32 %v376_v42, %v375_v40 }
 0x10f   : > { %v390_v45 = vadd.f32 %v389_v43, %v388_v41 }
 0x110   : > { %v378_v46 = vrot.slane %v377_v44, 2 }
 0x111   : > { %v391_v49 = vrot.slane %v390_v45, 2 }
 0x112   : > { %v379_v50 = vadd.f32 %v378_v46, %v377_v44 }
 0x113   : > { %v392_v51 = vadd.f32 %v391_v49, %v390_v45 }
 0x114   : > { %v380_v52 = vrot.slane %v379_v50, 1 }
 0x115   : > { %v393_v56 = vrot.slane %v392_v51, 1 }
 0x116   : > { %v943_v57 = vadd.f32 %v380_v52, %v379_v50 }
 0x117   : > { %v945_v58 = vadd.f32 %v393_v56, %v392_v51 }
 0x118   : > { %v397_v59 = vmul.f32 %v658_v53, %v943_v57 }
 0x119   : > { %v398_v63 = vmul.f32 %v658_v53, %v945_v58 }
 0x11a   : > { %v399_v0 = vsub.f32 %v873_v54, %v397_v59  ;;  %v401_v1 = vsub.f32 %v876_v55, %v397_v59  ;;  %v403_v2 = vsub.f32 %v893_v4, %v397_v59  ;;  %v405_v3 = vsub.f32 %v359_v17, %v397_v59 }
 0x11b   : > { %v407_v5 = vsub.f32 %v361_v22, %v397_v59  ;;  %v409_v6 = vsub.f32 %v363_v28, %v397_v59  ;;  %v411_v8 = vsub.f32 %v365_v32, %v397_v59  ;;  %v413_v9 = vsub.f32 %v931_v34, %v397_v59 }
 0x11c   : > { %v415_v12 = vmul.f32 %v867_v47, %v399_v0  ;;  %v417_v14 = vmul.f32 %v870_v48, %v401_v1  ;;  %v419_v15 = vmul.f32 %v885_v62, %v403_v2  ;;  %v421_v16 = vmul.f32 %v899_v11, %v405_v3 }
 0x11d   : > { %v423_v55 = vmul.f32 %v903_v13, %v407_v5  ;;  %v425_v4 = vmul.f32 %v908_v20, %v409_v6  ;;  %v400_v23 = vsub.f32 %v879_v60, %v398_v63  ;;  %v402_v25 = vsub.f32 %v882_v61, %v398_v63 }
 0x11e   : > { %v431_v18 = vmul.f32 %v415_v12, %v415_v12  ;;  %v433_v54 = vmul.f32 %v417_v14, %v417_v14  ;;  %v435_v17 = vmul.f32 %v419_v15, %v419_v15  ;;  %v437_v19 = vmul.f32 %v421_v16, %v421_v16 }
 0x11f   : > { %v404_v28 = vsub.f32 %v896_v10, %v398_v63  ;;  %v406_v29 = vsub.f32 %v911_v21, %v398_v63  ;;  %v408_v31 = vsub.f32 %v915_v24, %v398_v63  ;;  %v410_v32 = vsub.f32 %v926_v30, %v398_v63 }
 0x120   : > { %v447_v22 = vadd.f32 %v433_v54, %v431_v18  ;;  %v412_v33 = vsub.f32 %v934_v35, %v398_v63  ;;  %v414_v7 = vsub.f32 %v938_v36, %v398_v63  ;;  %v416_v37 = vmul.f32 %v867_v47, %v400_v23 }
 0x121   : > { %v418_v38 = vmul.f32 %v870_v48, %v402_v25  ;;  %v420_v60 = vmul.f32 %v885_v62, %v404_v28  ;;  %v427_v61 = vmul.f32 %v919_v26, %v411_v8  ;;  %v439_v10 = vmul.f32 %v423_v55, %v423_v55 }
 0x122   : > { %v448_v34 = vadd.f32 %v447_v22, %v435_v17  ;;  %v432_v21 = vmul.f32 %v416_v37, %v416_v37  ;;  %v422_v24 = vmul.f32 %v899_v11, %v406_v29  ;;  %v429_v30 = vmul.f32 %v922_v27, %v413_v9 }
 0x123   : > { %v434_v40 = vmul.f32 %v418_v38, %v418_v38  ;;  %v441_v35 = vmul.f32 %v425_v4, %v425_v4  ;;  %v424_v36 = vmul.f32 %v903_v13, %v408_v31  ;;  %v436_v42 = vmul.f32 %v420_v60, %v420_v60 }
 0x124   : > { %v449_v39 = vadd.f32 %v448_v34, %v437_v19  ;;  %v443_v43 = vmul.f32 %v427_v61, %v427_v61  ;;  %v426_v62 = vmul.f32 %v908_v20, %v410_v32  ;;  %v438_v44 = vmul.f32 %v422_v24, %v422_v24 }
 0x125   : > { %v460_v47 = vadd.f32 %v434_v40, %v432_v21  ;;  %v445_v46 = vmul.f32 %v429_v30, %v429_v30  ;;  %v428_v50 = vmul.f32 %v919_v26, %v412_v33  ;;  %v440_v11 = vmul.f32 %v424_v36, %v424_v36 }
 0x126   : > { %v450_v41 = vadd.f32 %v449_v39, %v439_v10  ;;  %v430_v53 = vmul.f32 %v922_v27, %v414_v7  ;;  %v442_v56 = vmul.f32 %v426_v62, %v426_v62 }
 0x127   : > { %v461_v45 = vadd.f32 %v460_v47, %v436_v42  ;;  %v444_v63 = vmul.f32 %v428_v50, %v428_v50 }
 0x128   : > { %v451_v48 = vadd.f32 %v450_v41, %v441_v35  ;;  %v446_v2 = vmul.f32 %v430_v53, %v430_v53 }
 0x129   : > { %v462_v51 = vadd.f32 %v461_v45, %v438_v44 }
 0x12a   : > { %v452_v49 = vadd.f32 %v451_v48, %v443_v43 }
 0x12b   : > { %v463_v13 = vadd.f32 %v462_v51, %v440_v11 }
 0x12c   : > { %v453_v52 = vadd.f32 %v452_v49, %v445_v46 }
 0x12d   : > { %v464_v0 = vadd.f32 %v463_v13, %v442_v56 }
 0x12e   : > { %v454_v59 = vrot.slane %v453_v52, 4 }
 0x12f   : > { %v465_v20 = vadd.f32 %v464_v0, %v444_v63 }
 0x130   : > { %v455_v1 = vadd.f32 %v454_v59, %v453_v52 }
 0x131   : > { %v466_v5 = vadd.f32 %v465_v20, %v446_v2 }
 0x132   : > { %v456_v3 = vrot.slane %v455_v1, 2 }
 0x133   : > { %v467_v8 = vrot.slane %v466_v5, 4 }
 0x134   : > { %v457_v6 = vadd.f32 %v456_v3, %v455_v1 }
 0x135   : > { %v468_v9 = vadd.f32 %v467_v8, %v466_v5 }
 0x136   : > { %v458_v26 = vrot.slane %v457_v6, 1 }
 0x137   : > { %v469_v14 = vrot.slane %v468_v9, 2 }
 0x138   : > { %v459_v12 = vadd.f32 %v458_v26, %v457_v6 }
 0x139   : > { %v470_v15 = vadd.f32 %v469_v14, %v468_v9 }
 0x13a   : > { %v474_v27 = vsel %vm473_vm9, %v943_v57, %v459_v12 }
 0x13b   : > { %v471_v16 = vrot.slane %v470_v15, 1 }
 0x13d   : > { %v472_v18 = vadd.f32 %v471_v16, %v470_v15 }
 0x13f   : > { %v475_v54 = vsel %vm473_vm9, %v945_v58, %v472_v18 }
 0x140   : > { %v478_v55 = vcombine.low %v474_v27, %v475_v54 }
 0x142   : > { %586 = vst.sshfl [vmem:[%s137_s25] sm:$0x33 pattern:$0x76325410] %v478_v55 }
 0x143   : > { %672 = shalt.err (!%p669_p4)
}
 0x144   : > { %s673_s8 = scalar_lea.hbm %s984_s30, 64  ;;  %s677_s17 = scalar_lea.hbm %s1028_s2, 128 }
 0x145   : > { %p674_p7 = scmp.ne.s32.totalorder %s984_s30, %s673_s8  ;;  %p678_p10 = scmp.lt.u32.totalorder %s984_s30, %s1028_s2 }
 0x146   : > { %p679_p11 = scmp.lt.u32.totalorder %s677_s17, %s673_s8  ;;  %p681_p13 = scmp.lt.u32.totalorder %s673_s8, %s984_s30 }
 0x147   : > { %p675_p8 = pnand %p674_p7, %p778_p5 }
 0x148   : > { %p680_p12 = por %p679_p11, %p678_p10 }
 0x149   : > { %p676_p9 = pneg %p675_p8 }
 0x14a   : > { %p682_p0 = por %p681_p13, %p680_p12 }
 0x14c   : > { %p683_p1 = pnand %p682_p0, %p676_p9 }
 0x14e   : > { %686 = shalt.err (!%p683_p1)
}
 0x14f   : > { %617 = dma.vmem_to_hbm [thread:$0]  (%p778_p5), %s986_s26, 64, %s984_s30, %s489_s3  }
 0x150 PF: > { %p623_p2 = scmp.ge.s32.totalorder %s721_s12, 2  ;;  %s515_s13 = sand.u32 1, %s709_s9  }
 0x151   : > { %s516_s22 = scalar_lea.sflag [#allocation3], %s515_s13 }
 0x152   : > { %p620_p3 = pnand %p623_p2, %p782_p6 }
 0x154   : > { %704 = dma.done.wait (!%p620_p3), %s516_s22, 64  }
 0x155   : > { %706 = vsyncadd (!%p620_p3), %s516_s22, 4294967232  ;;  %p12_p4 = scmp.ge.s32.totalorder %s765_s15, 4   ;;  %s1032_s9 = smov %s713_s10 }
 0x156   : > { %s1033_s10 = smov %s717_s11  ;;  %s1034_s11 = smov %s776_s18 }
 0x157   : > { %s1035_s12 = smov %s765_s15  ;;  %14 = sbr.rel (!%p12_p4) target bundleno = 3 (0x3), region = 63 }
 0x15e   :  { %521 = vsyncpa [#allocation3], 1 }
 0x15f   :  { %523 = vsyncpa [#allocation3 + $0x1], 1 }

</bundles_post_ra>
